<compile_context>
chip_gen: v7x
topology: tpu7x:2x2x1
jax: 0.10.0
libtpu: 0.0.40
codegen_flags: <defaults>
</compile_context>

<pallas_src>
import jax
import jax.numpy as jnp
from jax.experimental import pallas as pl
from jax.experimental.pallas import tpu as pltpu


def _classifier_scale_kernel(x_ref, w1_ref, c0_ref, c1_ref, w2_ref, b2_ref, o_ref):
    # lin1 (bias-free) with the BN scale already folded into the bf16 weight columns.
    h = jnp.dot(x_ref[...].astype(jnp.bfloat16), w1_ref[...],
                preferred_element_type=jnp.float32)
    # Polynome_ACT with the BN shift folded into the coefficients (Horner, f32):
    #   a = c0 + c1*h + 0.09*h^2
    a = c0_ref[...] + h * (c1_ref[...] + 0.09 * h)
    # lin2 on the current O-tile: bf16 MXU matmul, f32 accumulate, + bias.
    o_ref[...] = (jnp.dot(a.astype(jnp.bfloat16), w2_ref[...],
                          preferred_element_type=jnp.float32)
                  + b2_ref[...]).astype(o_ref.dtype)


def prepare_classifier_scale_params(w1, bn_gamma, bn_beta, bn_mean, bn_var, w2, b2,
                                    eps=1e-5):
    """One-time prep (hoisted out of the per-call path).

    w1: [inter, fcsize] (lin1.weight), w2: [out, inter] (lin2.weight), b2: [out].
    Returns:
      w1_scaled : bf16 [F, I]   lin1 weight, transposed, BN scale folded in
      c0, c1    : f32  [1, I]   polynomial coefficients with BN shift folded in
      w2_pad    : bf16 [I, Opad] lin2 weight, transposed, O zero-padded to mult of 128
      b2_pad    : f32  [1, Opad] lin2 bias, zero-padded
      out_f     : int            true output width (for optional cropping)
    """
    inter = w1.shape[0]
    out_f = w2.shape[0]
    out_pad = ((out_f + 127) // 128) * 128          # lane-dense output (1000 -> 1024)

    inv_std = 1.0 / jnp.sqrt(bn_var.astype(jnp.float32) + eps)
    scale = bn_gamma.astype(jnp.float32) * inv_std                       # [I]
    shift = (bn_beta.astype(jnp.float32)
             - bn_mean.astype(jnp.float32) * scale)                      # [I]

    # Fold BN scale into lin1's (transposed) weight columns: h = x @ (w1.T * scale).
    w1_scaled = (w1.astype(jnp.float32).T * scale[None, :]).astype(jnp.bfloat16)

    # Fold BN shift s into the polynomial: 0.47 + 0.5*(h+s) + 0.09*(h+s)^2
    #   = (0.47 + 0.5*s + 0.09*s^2) + (0.5 + 0.18*s)*h + 0.09*h^2
    c0 = (0.47 + 0.5 * shift + 0.09 * shift * shift).reshape(1, inter)   # [1, I]
    c1 = (0.5 + 0.18 * shift).reshape(1, inter)                          # [1, I]

    # Transpose lin2 weight to [I, O] and zero-pad O to a multiple of 128.
    w2_t = w2.astype(jnp.float32).T.astype(jnp.bfloat16)
    w2_pad = jnp.zeros((inter, out_pad), jnp.bfloat16).at[:, :out_f].set(w2_t)
    b2_pad = jnp.zeros((1, out_pad), jnp.float32).at[0, :out_f].set(
        b2.astype(jnp.float32))
    return w1_scaled, c0, c1, w2_pad, b2_pad, out_f


def classifier_scale(x, w1_scaled, c0, c1, w2_pad, b2_pad, *, tn=None,
                     out_dtype=jnp.float32):
    """x: [B, fcsize] f32.  Params come from prepare_classifier_scale_params.

    Returns the lane-dense padded logits [B, O_pad] (padded columns are exactly 0);
    crop with out[:, :out_features] at the consumer if the true width is needed.
    tn=None -> single grid step (best on v5e/v6e); tn=512 -> grid=(2,) for v7x
    megacore.
    """
    B, F = x.shape
    I = w1_scaled.shape[1]
    O_pad = w2_pad.shape[1]
    if tn is None:
        tn = O_pad                                   # collapsed grid: one step
    assert O_pad % tn == 0
    n_tiles = O_pad // tn

    bytes_accessed = (x.size * 4 + w1_scaled.size * 2 + c0.size * 4 + c1.size * 4
                      + w2_pad.size * 2 + b2_pad.size * 4
                      + B * O_pad * jnp.dtype(out_dtype).itemsize)
    cost = pl.CostEstimate(
        flops=n_tiles * 2 * B * F * I + 2 * B * I * O_pad,
        transcendentals=0,
        bytes_accessed=bytes_accessed)

    out_padded = pl.pallas_call(
        _classifier_scale_kernel,
        out_shape=jax.ShapeDtypeStruct((B, O_pad), out_dtype),
        grid=(n_tiles,),
        in_specs=[
            pl.BlockSpec((B, F), lambda j: (0, 0)),    # x
            pl.BlockSpec((F, I), lambda j: (0, 0)),    # BN-folded lin1 weight (bf16)
            pl.BlockSpec((1, I), lambda j: (0, 0)),    # poly coeff c0
            pl.BlockSpec((1, I), lambda j: (0, 0)),    # poly coeff c1
            pl.BlockSpec((I, tn), lambda j: (0, j)),   # lin2 weight tile (bf16)
            pl.BlockSpec((1, tn), lambda j: (0, j)),   # lin2 bias tile
        ],
        out_specs=pl.BlockSpec((B, tn), lambda j: (0, j)),
        compiler_params=pltpu.CompilerParams(
            dimension_semantics=("parallel",)),
        cost_estimate=cost,
    )(x.astype(jnp.float32), w1_scaled, c0, c1, w2_pad, b2_pad)

    return out_padded


if __name__ == "__main__":
    # Small shapes consistent with the module: fcsize=32, inter=128, lin2 out = 1000.
    B, FCSIZE, INTER, OUT = 8, 32, 128, 1000

    key = jax.random.PRNGKey(0)
    kx, kw1, kg, kb, km, kv, kw2, kb2 = jax.random.split(key, 8)

    x = jax.random.normal(kx, (B, FCSIZE), jnp.float32)

    # Deterministic synthetic parameters (shapes follow nn.Linear / nn.BatchNorm1d).
    w1 = jax.random.normal(kw1, (INTER, FCSIZE), jnp.float32) * 0.05     # lin1.weight
    bn_gamma = 1.0 + 0.1 * jax.random.normal(kg, (INTER,), jnp.float32)
    bn_beta = 0.1 * jax.random.normal(kb, (INTER,), jnp.float32)
    bn_mean = 0.1 * jax.random.normal(km, (INTER,), jnp.float32)
    bn_var = jnp.abs(jax.random.normal(kv, (INTER,), jnp.float32)) + 0.5
    w2 = jax.random.normal(kw2, (OUT, INTER), jnp.float32) * 0.05        # lin2.weight
    b2 = 0.1 * jax.random.normal(kb2, (OUT,), jnp.float32)               # lin2.bias

    # One-time parameter prep (BN fold into weights/coefficients, transpose,
    # bf16 cast, O padding).
    params = prepare_classifier_scale_params(w1, bn_gamma, bn_beta, bn_mean, bn_var,
                                             w2, b2)
    params = jax.tree_util.tree_map(
        lambda p: jax.block_until_ready(p) if hasattr(p, "block_until_ready") else p,
        params)
    w1s, c0, c1, w2_pad, b2_pad, out_f = params

    # Single-step kernel (grid=(1,)).  For v7x megacore, pass tn=512 -> grid=(2,).
    out_padded = classifier_scale(x, w1s, c0, c1, w2_pad, b2_pad)
    out_padded = jax.block_until_ready(out_padded)

    # Consumer-side crop to the true 1000 classes (padded columns are exactly 0).
    out = out_padded[:, :out_f]

    # Pure-JAX f32 reference for a correctness sanity check (kernel uses bf16
    # weights with f32 accumulation, so tolerance is set for bf16 rounding).
    h_ref = x @ w1.T
    h_ref = (h_ref - bn_mean) / jnp.sqrt(bn_var + 1e-5) * bn_gamma + bn_beta
    a_ref = 0.47 + 0.5 * h_ref + 0.09 * h_ref ** 2
    ref = a_ref @ w2.T + b2

    assert out_padded.shape == (B, ((OUT + 127) // 128) * 128)
    assert out.shape == (B, OUT)
    assert jnp.allclose(out, ref, atol=5e-2, rtol=5e-2)
    # Padded tail columns must be exactly zero.
    assert jnp.all(out_padded[:, out_f:] == 0.0)
    print("KERNEL_OK")
</pallas_src>

<mosaic_0001>
module attributes {stable_mosaic.version = 11 : i64} {
  func.func @_classifier_scale_kernel(%arg0: i32, %arg1: memref<8x32xf32, #tpu.memory_space<vmem>>, %arg2: memref<32x128xbf16, #tpu.memory_space<vmem>>, %arg3: memref<1x128xf32, #tpu.memory_space<vmem>>, %arg4: memref<1x128xf32, #tpu.memory_space<vmem>>, %arg5: memref<128x1024xbf16, #tpu.memory_space<vmem>>, %arg6: memref<1x1024xf32, #tpu.memory_space<vmem>>, %arg7: memref<8x1024xf32, #tpu.memory_space<vmem>>) attributes {dimension_semantics = [#tpu.dimension_semantics<parallel>], iteration_bounds = array<i64: 1>, scalar_prefetch = 0 : i64, scratch_operands = 0 : i64, tpu.core_type = #tpu.core_type<tc>, window_params = [{pipeline_mode = #tpu.pipeline_mode<synchronous>, transform_indices = @transform_0, window_bounds = array<i64: 8, 32>}, {pipeline_mode = #tpu.pipeline_mode<synchronous>, transform_indices = @transform_1, window_bounds = array<i64: 32, 128>}, {pipeline_mode = #tpu.pipeline_mode<synchronous>, transform_indices = @transform_2, window_bounds = array<i64: 1, 128>}, {pipeline_mode = #tpu.pipeline_mode<synchronous>, transform_indices = @transform_3, window_bounds = array<i64: 1, 128>}, {transform_indices = @transform_4, window_bounds = array<i64: 128, 1024>}, {transform_indices = @transform_5, window_bounds = array<i64: 1, 1024>}, {transform_indices = @transform_6, window_bounds = array<i64: 8, 1024>}]} {
    %c0 = arith.constant 0 : index
    %c0_0 = arith.constant 0 : index
    %0 = vector.load %arg1[%c0, %c0_0] : memref<8x32xf32, #tpu.memory_space<vmem>>, vector<8x32xf32>
    %1 = arith.truncf %0 : vector<8x32xf32> to vector<8x32xbf16>
    %c0_1 = arith.constant 0 : index
    %c0_2 = arith.constant 0 : index
    %2 = vector.load %arg2[%c0_1, %c0_2] : memref<32x128xbf16, #tpu.memory_space<vmem>>, vector<32x128xbf16>
    %cst = arith.constant dense<0.000000e+00> : vector<8x128xf32>
    %3 = tpu.matmul %1, %2, %cst {dimension_numbers = #tpu.dot_dimension_numbers<[1], [0], [0], [1], [0, 0, 1, 1], [], []>} : vector<8x32xbf16>, vector<32x128xbf16>, vector<8x128xf32> -> vector<8x128xf32>
    %c0_3 = arith.constant 0 : index
    %c0_4 = arith.constant 0 : index
    %4 = vector.load %arg3[%c0_3, %c0_4] : memref<1x128xf32, #tpu.memory_space<vmem>>, vector<1x128xf32>
    %c0_5 = arith.constant 0 : index
    %c0_6 = arith.constant 0 : index
    %5 = vector.load %arg4[%c0_5, %c0_6] : memref<1x128xf32, #tpu.memory_space<vmem>>, vector<1x128xf32>
    %cst_7 = arith.constant 9.000000e-02 : f32
    %6 = vector.broadcast %cst_7 : f32 to vector<8x128xf32>
    %7 = arith.mulf %6, %3 : vector<8x128xf32>
    %8 = vector.broadcast %5 : vector<1x128xf32> to vector<8x128xf32>
    %9 = arith.addf %8, %7 : vector<8x128xf32>
    %10 = arith.mulf %3, %9 : vector<8x128xf32>
    %11 = vector.broadcast %4 : vector<1x128xf32> to vector<8x128xf32>
    %12 = arith.addf %11, %10 : vector<8x128xf32>
    %13 = arith.truncf %12 : vector<8x128xf32> to vector<8x128xbf16>
    %c0_8 = arith.constant 0 : index
    %c0_9 = arith.constant 0 : index
    %14 = vector.load %arg5[%c0_8, %c0_9] : memref<128x1024xbf16, #tpu.memory_space<vmem>>, vector<128x1024xbf16>
    %cst_10 = arith.constant dense<0.000000e+00> : vector<8x1024xf32>
    %15 = tpu.matmul %13, %14, %cst_10 {dimension_numbers = #tpu.dot_dimension_numbers<[1], [0], [0], [1], [0, 0, 1, 1], [], []>} : vector<8x128xbf16>, vector<128x1024xbf16>, vector<8x1024xf32> -> vector<8x1024xf32>
    %c0_11 = arith.constant 0 : index
    %c0_12 = arith.constant 0 : index
    %16 = vector.load %arg6[%c0_11, %c0_12] : memref<1x1024xf32, #tpu.memory_space<vmem>>, vector<1x1024xf32>
    %17 = vector.broadcast %16 : vector<1x1024xf32> to vector<8x1024xf32>
    %18 = arith.addf %15, %17 : vector<8x1024xf32>
    %c0_13 = arith.constant 0 : index
    %c0_14 = arith.constant 0 : index
    %19 = vector.load %arg7[%c0_13, %c0_14] : memref<8x1024xf32, #tpu.memory_space<vmem>>, vector<8x1024xf32>
    tpu.vector_store %arg7[%c0_13, %c0_14], %18 {strides = array<i32>} : memref<8x1024xf32, #tpu.memory_space<vmem>>, vector<8x1024xf32>,
    return
  }
  func.func @transform_0(%arg0: i32) -> (i32, i32) {
    %c0_i32 = arith.constant 0 : i32
    %c0_i32_0 = arith.constant 0 : i32
    %c0_i32_1 = arith.constant 0 : i32
    return %c0_i32, %c0_i32_0 : i32, i32
  }
  func.func @transform_1(%arg0: i32) -> (i32, i32) {
    %c0_i32 = arith.constant 0 : i32
    %c0_i32_0 = arith.constant 0 : i32
    %c0_i32_1 = arith.constant 0 : i32
    return %c0_i32, %c0_i32_0 : i32, i32
  }
  func.func @transform_2(%arg0: i32) -> (i32, i32) {
    %c0_i32 = arith.constant 0 : i32
    %c0_i32_0 = arith.constant 0 : i32
    %c0_i32_1 = arith.constant 0 : i32
    return %c0_i32, %c0_i32_0 : i32, i32
  }
  func.func @transform_3(%arg0: i32) -> (i32, i32) {
    %c0_i32 = arith.constant 0 : i32
    %c0_i32_0 = arith.constant 0 : i32
    %c0_i32_1 = arith.constant 0 : i32
    return %c0_i32, %c0_i32_0 : i32, i32
  }
  func.func @transform_4(%arg0: i32) -> (i32, i32) {
    %c0_i32 = arith.constant 0 : i32
    %c0_i32_0 = arith.constant 0 : i32
    return %c0_i32, %arg0 : i32, i32
  }
  func.func @transform_5(%arg0: i32) -> (i32, i32) {
    %c0_i32 = arith.constant 0 : i32
    %c0_i32_0 = arith.constant 0 : i32
    return %c0_i32, %arg0 : i32, i32
  }
  func.func @transform_6(%arg0: i32) -> (i32, i32) {
    %c0_i32 = arith.constant 0 : i32
    %c0_i32_0 = arith.constant 0 : i32
    return %c0_i32, %arg0 : i32, i32
  }
}

</mosaic_0001>

<bundles_post_ra>
// kernel: tpu_custom_call.1
= control target key start
LH: loop header
LB: loop body
LE: loop exit
PB: predicated region body
PF: predicated region fallthrough
CT: control target
= control target key end

     0   :  { %11 = vsyncpa [#allocation3], 0  ;;  %s1055_s0 = inlined_call_operand.hbm [shape: f32[8,32], index: 0, kind: input, shape index: {}]   ;;  %s1056_s1 = inlined_call_operand.hbm [shape: bf16[32,128], index: 1, kind: input, shape index: {}]   ;;  %s1057_s2 = inlined_call_operand.vmem [shape: f32[1,128], index: 2, kind: input, shape index: {}]   ;;  %s1058_s3 = inlined_call_operand.vmem [shape: f32[1,128], index: 3, kind: input, shape index: {}]   ;;  %s1059_s4 = inlined_call_operand.hbm [shape: bf16[128,1024], index: 4, kind: input, shape index: {}]   ;;  %s1060_s5 = inlined_call_operand.vmem [shape: f32[1,1024], index: 5, kind: input, shape index: {}]   ;;  %s1061_s6 = inlined_call_operand.hbm [shape: f32[8,1024], index: 6, kind: output, shape index: {}]  }
   0x1   :  { %12 = vsyncpa [#allocation6], 0 }
   0x2   :  { %13 = vsyncpa [#allocation4], 0  ;;  %s946_s21 = smov [#allocation5]   ;;  %s852_s25 = scalar_lea.hbm %s1056_s1, 256 }
   0x3   :  { %s29_s22 = sshll.u32 %s946_s21, 4  ;;  %p853_p0 = scmp.ne.s32.totalorder %s1056_s1, %s852_s25  ;;  %s30_s22 = int_to_ptr.vmem [resolvable:$true] %s29_s22 }
   0x4   :  { %p856_p1 = scmp.lt.u32.totalorder %s852_s25, %s1056_s1 }
   0x6   :  { %p858_p2 = pnand %p856_p1, %p853_p0 }
   0x8   :  { %861 = shalt.err (!%p858_p2)
}
   0x9   :  { %s862_s30 = scalar_lea.vmem %s30_s22, 256  ;;  %p867_p4 = scmp.lt.s32.totalorder %s30_s22, %s30_s22 }
   0xa   :  { %p863_p3 = scmp.ne.s32.totalorder %s30_s22, %s862_s30  ;;  %p868_p5 = scmp.lt.s32.totalorder %s862_s30, %s862_s30 }
   0xc   :  { %p869_p6 = por %p868_p5, %p867_p4 }
   0xe   :  { %p870_p7 = pnand %p869_p6, %p863_p3 }
  0x10   :  { %873 = shalt.err (!%p870_p7)
}
  0x11   :  { %s947_s7 = smov 64   ;;  %s948_s8 = smov 4  }
  0x12   :  { %35 = dma.hbm_to_vmem [thread:$0]  %s1056_s1, 256, %s30_s22, [#allocation6], %s947_s7, %s947_s7, %s948_s8  }
  0x13   :  { %s949_s11 = smov [#allocation2]   ;;  %s950_s13 = smov [#allocation7]  }
  0x14   :  { %s20_s12 = sshll.u32 %s949_s11, 4  ;;  %s45_s14 = sshll.u32 %s950_s13, 4  ;;  %s21_s12 = int_to_ptr.vmem [resolvable:$true] %s20_s12  ;;  %s46_s14 = int_to_ptr.vmem [resolvable:$true] %s45_s14 }
  0x15   :  { %s874_s17 = scalar_lea.hbm %s1055_s0, 128 }
  0x16   :  { %p875_p8 = scmp.ne.s32.totalorder %s1055_s0, %s874_s17  ;;  %p878_p9 = scmp.lt.u32.totalorder %s874_s17, %s1055_s0 }
  0x18   :  { %p880_p10 = pnand %p878_p9, %p875_p8 }
  0x1a   :  { %883 = shalt.err (!%p880_p10)
}
  0x1b   :  { %s884_s1 = scalar_lea.vmem %s21_s12, 128  ;;  %p889_p12 = scmp.lt.s32.totalorder %s21_s12, %s21_s12 }
  0x1c   :  { %p885_p11 = scmp.ne.s32.totalorder %s21_s12, %s884_s1  ;;  %p890_p13 = scmp.lt.s32.totalorder %s884_s1, %s884_s1 }
  0x1e   :  { %p891_p0 = por %p890_p13, %p889_p12 }
  0x20   :  { %p892_p1 = pnand %p891_p0, %p885_p11 }
  0x22   :  { %895 = shalt.err (!%p892_p1)
}
  0x23   :  { %23 = dma.hbm_to_vmem [thread:$0]  %s1055_s0, 128, %s21_s12, [#allocation3]  }
  0x24   :  { %s896_s26 = scalar_lea.hbm %s1059_s4, 8192 }
  0x25   :  { %p897_p2 = scmp.ne.s32.totalorder %s1059_s4, %s896_s26  ;;  %p900_p3 = scmp.lt.u32.totalorder %s896_s26, %s1059_s4 }
  0x27   :  { %p902_p4 = pnand %p900_p3, %p897_p2 }
  0x29   :  { %905 = shalt.err (!%p902_p4)
}
  0x2a   :  { %s906_s7 = scalar_lea.vmem %s46_s14, 8192  ;;  %p911_p6 = scmp.lt.s32.totalorder %s46_s14, %s46_s14 }
  0x2b   :  { %p907_p5 = scmp.ne.s32.totalorder %s46_s14, %s906_s7  ;;  %p912_p7 = scmp.lt.s32.totalorder %s906_s7, %s906_s7 }
  0x2d   :  { %p913_p8 = por %p912_p7, %p911_p6 }
  0x2f   :  { %p914_p9 = pnand %p913_p8, %p907_p5 }
  0x31   :  { %917 = shalt.err (!%p914_p9)
}
  0x32   :  { %s951_s0 = smov 512   ;;  %s952_s8 = smov 32  }
  0x33   :  { %51 = dma.hbm_to_vmem [thread:$0]  %s1059_s4, 8192, %s46_s14, [#allocation6], %s951_s0, %s951_s0, %s952_s8  }
  0x34   :  { %940 = dma.done.wait [#allocation3], 128  }
  0x35   :  { %941 = vsyncadd [#allocation3], 4294967168 }
  0x36   :  { %942 = dma.done.wait [#allocation6], 8448  }
  0x37   :  { %943 = vsyncadd [#allocation6], 4294958848  ;;  %v953_v0 = vmov 0.0   ;;  %vm954_vm0 = vmmov 0   ;;  %v850_v1 = vld [vmem:[#allocation5] sm:$0xff]   ;;  %v851_v2 = vld [vmem:[#allocation5 + $0x8] sm:$0xff]  }
  0x38   :  { %831 = vmatprep.subr.bf16.mxu0 %v953_v0  ;;  %835 = vmatprep.mubr.msk.bf16.mxu0 %vm954_vm0, %v953_v0  ;;  %v64_v3 = vld [vmem:[#allocation2] sm:$0xff]  ;;  %v145_v4 = vld [vmem:[#allocation7] sm:$0xff]  ;;  %vm82_vm1 = vcmask 261120  }
  0x39   :  { %832 = vmatpush3.bf16.msra.mxu0 %v850_v1  ;;  %v149_v5 = vld [vmem:[#allocation7 + $0x20] sm:$0xff]  ;;  %v146_v7 = vld [vmem:[#allocation7 + $0x8] sm:$0xff]  ;;  %v65_v15 = vpack.c.bf16 %v64_v3, %v64_v3 }
  0x3a   :  { %833 = vmatprep.subr.bf16.mxu0 %v953_v0  ;;  %v765_v6 = vcombine.high %v145_v4, %v149_v5  ;;  %v150_v8 = vld [vmem:[#allocation7 + $0x28] sm:$0xff]  ;;  %v764_v9 = vcombine.low %v145_v4, %v149_v5  ;;  %v153_v10 = vld [vmem:[#allocation7 + $0x40] sm:$0xff]  ;;  %v147_v5 = vld [vmem:[#allocation7 + $0x10] sm:$0xff] }
  0x3b   :  { %v767_v11 = vcombine.high %v146_v7, %v150_v8  ;;  %v157_v12 = vld [vmem:[#allocation7 + $0x60] sm:$0xff]  ;;  %v154_v13 = vld [vmem:[#allocation7 + $0x48] sm:$0xff]  ;;  %v766_v19 = vcombine.low %v146_v7, %v150_v8  ;;  %v148_v7 = vld [vmem:[#allocation7 + $0x18] sm:$0xff] }
  0x3c   :  { %v158_v14 = vld [vmem:[#allocation7 + $0x68] sm:$0xff]  ;;  %571 = vmatprep.subr.bf16.mxu1 %v765_v6  ;;  %v773_v16 = vcombine.high %v153_v10, %v157_v12  ;;  %v161_v17 = vld [vmem:[#allocation7 + $0x80] sm:$0xff]  ;;  %v772_v20 = vcombine.low %v153_v10, %v157_v12  ;;  %v151_v6 = vld [vmem:[#allocation7 + $0x30] sm:$0xff] }
  0x3d   :  { %v165_v18 = vld [vmem:[#allocation7 + $0xa0] sm:$0xff]  ;;  %834 = vmatpush3.bf16.msra.mxu0 %v851_v2  ;;  %572 = vmatpush1.bf16.msra.mxu1 %v764_v9  ;;  %v775_v21 = vcombine.high %v154_v13, %v158_v14  ;;  %v162_v23 = vld [vmem:[#allocation7 + $0x88] sm:$0xff]  ;;  %v774_v27 = vcombine.low %v154_v13, %v158_v14  ;;  %v769_v8 = vcombine.high %v147_v5, %v151_v6  ;;  %v152_v9 = vld [vmem:[#allocation7 + $0x38] sm:$0xff]  ;;  %v955_v13 = vmov 0  }
  0x3e   :  { %612 = vmatprep.subr.bf16.mxu0 %v767_v11  ;;  %573 = vmatprep.subr.bf16.mxu1 %v773_v16  ;;  %v781_v22 = vcombine.high %v161_v17, %v165_v18  ;;  %v166_v24 = vld [vmem:[#allocation7 + $0xa8] sm:$0xff]  ;;  %v169_v25 = vld [vmem:[#allocation7 + $0xc0] sm:$0xff]  ;;  %v780_v28 = vcombine.low %v161_v17, %v165_v18  ;;  %v768_v10 = vcombine.low %v147_v5, %v151_v6 }
  0x3f   :  { %v173_v26 = vld [vmem:[#allocation7 + $0xe0] sm:$0xff]  ;;  %v783_v29 = vcombine.high %v162_v23, %v166_v24  ;;  %v170_v31 = vld [vmem:[#allocation7 + $0xc8] sm:$0xff]  ;;  %v782_v35 = vcombine.low %v162_v23, %v166_v24  ;;  %v770_v11 = vcombine.low %v148_v7, %v152_v9  ;;  %v771_v12 = vcombine.high %v148_v7, %v152_v9  ;;  %603 = vmatprep.mubr.bf16.mxu1 %v955_v13  ;;  %v155_v23 = vld [vmem:[#allocation7 + $0x50] sm:$0xff] }
  0x40   :  { %836 = vmatmul.mubr.msk.bf16.vlgmr.msra.gmra.mrb[0].mxu0 %vm82_vm1, %v65_v15  ;;  %v789_v30 = vcombine.high %v169_v25, %v173_v26  ;;  %v174_v32 = vld [vmem:[#allocation7 + $0xe8] sm:$0xff]  ;;  %v177_v33 = vld [vmem:[#allocation7 + $0x100] sm:$0xff]  ;;  %v788_v36 = vcombine.low %v169_v25, %v173_v26  ;;  %v159_v24 = vld [vmem:[#allocation7 + $0x70] sm:$0xff] }
  0x41   :  { %613 = vmatpush1.bf16.msra.mxu0 %v766_v19  ;;  %574 = vmatpush1.bf16.msra.mxu1 %v772_v20  ;;  %v181_v34 = vld [vmem:[#allocation7 + $0x120] sm:$0xff]  ;;  %v791_v37 = vcombine.high %v170_v31, %v174_v32  ;;  %v178_v39 = vld [vmem:[#allocation7 + $0x108] sm:$0xff]  ;;  %v790_v43 = vcombine.low %v170_v31, %v174_v32  ;;  %v156_v25 = vld [vmem:[#allocation7 + $0x58] sm:$0xff] }
  0x42   :  { %614 = vmatprep.subr.bf16.mxu0 %v775_v21  ;;  %575 = vmatprep.subr.bf16.mxu1 %v781_v22  ;;  %v797_v38 = vcombine.high %v177_v33, %v181_v34  ;;  %v182_v40 = vld [vmem:[#allocation7 + $0x128] sm:$0xff]  ;;  %v185_v41 = vld [vmem:[#allocation7 + $0x140] sm:$0xff]  ;;  %v796_v44 = vcombine.low %v177_v33, %v181_v34  ;;  %v160_v26 = vld [vmem:[#allocation7 + $0x78] sm:$0xff] }
  0x43   :  { %v189_v42 = vld [vmem:[#allocation7 + $0x160] sm:$0xff]  ;;  %v799_v45 = vcombine.high %v178_v39, %v182_v40  ;;  %v186_v47 = vld [vmem:[#allocation7 + $0x148] sm:$0xff]  ;;  %v798_v49 = vcombine.low %v178_v39, %v182_v40  ;;  %644 = vmatprep.mubr.bf16.mxu0 %v955_v13  ;;  %v163_v31 = vld [vmem:[#allocation7 + $0x90] sm:$0xff] }
  0x44   :  { %v805_v46 = vcombine.high %v185_v41, %v189_v42  ;;  %v190_v48 = vld [vmem:[#allocation7 + $0x168] sm:$0xff]  ;;  %v804_v50 = vcombine.low %v185_v41, %v189_v42  ;;  %v193_v53 = vld [vmem:[#allocation7 + $0x180] sm:$0xff]  ;;  %v167_v32 = vld [vmem:[#allocation7 + $0xb0] sm:$0xff] }
  0x45   :  { %615 = vmatpush1.bf16.msra.mxu0 %v774_v27  ;;  %576 = vmatpush1.bf16.msra.mxu1 %v780_v28  ;;  %v807_v51 = vcombine.high %v186_v47, %v190_v48  ;;  %v806_v52 = vcombine.low %v186_v47, %v190_v48  ;;  %v197_v54 = vld [vmem:[#allocation7 + $0x1a0] sm:$0xff]  ;;  %v194_v55 = vld [vmem:[#allocation7 + $0x188] sm:$0xff]  ;;  %v164_v33 = vld [vmem:[#allocation7 + $0x98] sm:$0xff] }
  0x46   :  { %616 = vmatprep.subr.bf16.mxu0 %v783_v29  ;;  %577 = vmatprep.subr.bf16.mxu1 %v789_v30  ;;  %v813_v56 = vcombine.high %v193_v53, %v197_v54  ;;  %v198_v57 = vld [vmem:[#allocation7 + $0x1a8] sm:$0xff]  ;;  %v812_v60 = vcombine.low %v193_v53, %v197_v54  ;;  %v201_v61 = vld [vmem:[#allocation7 + $0x1c0] sm:$0xff]  ;;  %v777_v29 = vcombine.high %v155_v23, %v159_v24  ;;  %v168_v34 = vld [vmem:[#allocation7 + $0xb8] sm:$0xff] }
  0x47   :  { %v814_v58 = vcombine.low %v194_v55, %v198_v57  ;;  %v815_v59 = vcombine.high %v194_v55, %v198_v57  ;;  %v205_v62 = vld [vmem:[#allocation7 + $0x1e0] sm:$0xff]  ;;  %v202_v63 = vld [vmem:[#allocation7 + $0x1c8] sm:$0xff]  ;;  %v779_v30 = vcombine.high %v156_v25, %v160_v26  ;;  %v171_v39 = vld [vmem:[#allocation7 + $0xd0] sm:$0xff] }
  0x48   :  { %v821_v0 = vcombine.high %v201_v61, %v205_v62  ;;  %v206_v1 = vld [vmem:[#allocation7 + $0x1e8] sm:$0xff]  ;;  %v820_v4 = vcombine.low %v201_v61, %v205_v62  ;;  %v175_v40 = vld [vmem:[#allocation7 + $0xf0] sm:$0xff]  ;;  %v172_v41 = vld [vmem:[#allocation7 + $0xd8] sm:$0xff] }
  0x49   :  { %617 = vmatpush1.bf16.msra.mxu0 %v782_v35  ;;  %578 = vmatpush1.bf16.msra.mxu1 %v788_v36  ;;  %v822_v2 = vcombine.low %v202_v63, %v206_v1  ;;  %v823_v3 = vcombine.high %v202_v63, %v206_v1  ;;  %v762_v15 = vld [vmem:[%s1058_s3] ss:$0 sm:$0xff]  ;;  %v776_v35 = vcombine.low %v155_v23, %v159_v24  ;;  %v176_v42 = vld [vmem:[#allocation7 + $0xf8] sm:$0xff]  ;;  %v179_v47 = vld [vmem:[#allocation7 + $0x110] sm:$0xff] }
  0x4a   :  { %618 = vmatprep.subr.bf16.mxu0 %v791_v37  ;;  %579 = vmatprep.subr.bf16.mxu1 %v797_v38  ;;  %v763_v21 = vld [vmem:[%s1057_s2] ss:$0 sm:$0xff]  ;;  %v778_v36 = vcombine.low %v156_v25, %v160_v26  ;;  %v785_v37 = vcombine.high %v163_v31, %v167_v32  ;;  %v787_v38 = vcombine.high %v164_v33, %v168_v34  ;;  %v183_v48 = vld [vmem:[#allocation7 + $0x130] sm:$0xff]  ;;  %v188_v57 = vld [vmem:[#allocation7 + $0x158] sm:$0xff] }
  0x4b   :  { %v801_v53 = vcombine.high %v179_v47, %v183_v48  ;;  %v187_v55 = vld [vmem:[#allocation7 + $0x150] sm:$0xff]  ;;  %v196_v1 = vld [vmem:[#allocation7 + $0x198] sm:$0xff] }
  0x4c   :  { %v195_v63 = vld [vmem:[#allocation7 + $0x190] sm:$0xff]  ;;  %v204_v9 = vld [vmem:[#allocation7 + $0x1d8] sm:$0xff] }
  0x4d   :  { %619 = vmatpush1.bf16.msra.mxu0 %v790_v43  ;;  %580 = vmatpush1.bf16.msra.mxu1 %v796_v44  ;;  %v784_v43 = vcombine.low %v163_v31, %v167_v32  ;;  %v786_v44 = vcombine.low %v164_v33, %v168_v34  ;;  %v203_v7 = vld [vmem:[#allocation7 + $0x1d0] sm:$0xff] }
  0x4e   :  { %620 = vmatprep.subr.bf16.mxu0 %v799_v45  ;;  %581 = vmatprep.subr.bf16.mxu1 %v805_v46  ;;  %v793_v45 = vcombine.high %v171_v39, %v175_v40  ;;  %v795_v46 = vcombine.high %v172_v41, %v176_v42 }
  0x51   :  { %621 = vmatpush1.bf16.msra.mxu0 %v798_v49  ;;  %582 = vmatpush1.bf16.msra.mxu1 %v804_v50  ;;  %v180_v49 = vld [vmem:[#allocation7 + $0x118] sm:$0xff] }
  0x52   :  { %622 = vmatprep.subr.bf16.mxu0 %v807_v51  ;;  %583 = vmatprep.subr.bf16.mxu1 %v813_v56  ;;  %v184_v50 = vld [vmem:[#allocation7 + $0x138] sm:$0xff]  ;;  %v792_v51 = vcombine.low %v171_v39, %v175_v40  ;;  %v191_v56 = vld [vmem:[#allocation7 + $0x170] sm:$0xff] }
  0x53   :  { %v803_v54 = vcombine.high %v180_v49, %v184_v50  ;;  %v809_v61 = vcombine.high %v187_v55, %v191_v56 }
  0x55   :  { %623 = vmatpush1.bf16.msra.mxu0 %v806_v52  ;;  %584 = vmatpush1.bf16.msra.mxu1 %v812_v60  ;;  %v794_v52 = vcombine.low %v172_v41, %v176_v42  ;;  %v802_v60 = vcombine.low %v180_v49, %v184_v50 }
  0x56   :  { %624 = vmatprep.subr.bf16.mxu0 %v815_v59  ;;  %585 = vmatprep.subr.bf16.mxu1 %v821_v0  ;;  %v800_v59 = vcombine.low %v179_v47, %v183_v48  ;;  %v199_v0 = vld [vmem:[#allocation7 + $0x1b0] sm:$0xff] }
  0x57   :  { %v817_v5 = vcombine.high %v195_v63, %v199_v0 }
  0x59   :  { %625 = vmatpush1.bf16.msra.mxu0 %v814_v58  ;;  %586 = vmatpush1.bf16.msra.mxu1 %v820_v4  ;;  %v192_v58 = vld [vmem:[#allocation7 + $0x178] sm:$0xff] }
  0x5a   :  { %626 = vmatprep.subr.bf16.mxu0 %v823_v3  ;;  %653 = vmatprep.subr.bf16.mxu1 %v769_v8  ;;  %v811_v62 = vcombine.high %v188_v57, %v192_v58  ;;  %v808_v3 = vcombine.low %v187_v55, %v191_v56  ;;  %v810_v4 = vcombine.low %v188_v57, %v192_v58  ;;  %v207_v8 = vld [vmem:[#allocation7 + $0x1f0] sm:$0xff] }
  0x5d   :  { %627 = vmatpush1.bf16.msra.mxu0 %v822_v2  ;;  %v200_v2 = vld [vmem:[#allocation7 + $0x1b8] sm:$0xff] }
  0x5e   :  { %694 = vmatprep.subr.bf16.mxu0 %v771_v12  ;;  %v819_v6 = vcombine.high %v196_v1, %v200_v2  ;;  %v818_v12 = vcombine.low %v196_v1, %v200_v2 }
 0x113   :  { %v120_v14 = vpop.f32.mrb[0].mxu0 }
 0x114   :  { %v128_v16 = vmul.f32 0.09, %v120_v14  ;;  %v837_v17 = vpop.f32.mrb[1].mxu0 }
 0x115   :  { %v123_v18 = vpop.f32.mrb[2].mxu0  ;;  %v211_v17 = vlaneseq }
 0x116   :  { %v135_v19 = vadd.f32 %v762_v15, %v128_v16  ;;  %v838_v20 = vpop.f32.mrb[3].mxu0  ;;  %v824_v15 = vcombine.low %v203_v7, %v207_v8 }
 0x117   :  { %v212_v18 = vshrl.u32 %v211_v17, 7 }
 0x118   :  { %v136_v22 = vmul.f32 %v135_v19, %v120_v14 }
 0x119   :  { %v213_v19 = vsub.s32 0, %v212_v18  ;;  %v221_v20 = vsub.s32 2, %v212_v18  ;;  %v225_v23 = vsub.s32 3, %v212_v18  ;;  %v229_v40 = vsub.s32 4, %v212_v18 }
 0x11a   :  { %v143_v27 = vadd.f32 %v763_v21, %v136_v22  ;;  %v209_v21 = vld [vmem:[%s1060_s5] sm:$0xff]  ;;  %v217_v22 = vsub.s32 1, %v212_v18  ;;  %v237_v41 = vsub.s32 6, %v212_v18  ;;  %v233_v42 = vsub.s32 5, %v212_v18  ;;  %s956_s5 = smov [#allocation8]  }
 0x11b   :  { %v214_v24 = vrot.slane %v209_v21, %v213_v19  ;;  %v222_v25 = vrot.slane %v209_v21, %v221_v20  ;;  %s749_s14 = sshll.u32 %s956_s5, 4  ;;  %s750_s14 = int_to_ptr.vmem [resolvable:$true] %s749_s14 }
 0x11c   :  { %v1034_v28 = vpack.c.bf16 %v143_v27, %v143_v27  ;;  %v218_v26 = vrot.slane %v209_v21, %v217_v22  ;;  %v226_v27 = vrot.slane %v209_v21, %v225_v23  ;;  %s918_s15 = scalar_lea.vmem %s750_s14, 1024  ;;  %p923_p11 = scmp.lt.s32.totalorder %s750_s14, %s750_s14 }
 0x11d   :  { %p919_p10 = scmp.ne.s32.totalorder %s750_s14, %s918_s15  ;;  %p924_p12 = scmp.lt.s32.totalorder %s918_s15, %s918_s15 }
 0x11e   :  { %604 = vmatmul.mubr.bf16.vlgmr.msra.gmra.mrb[0].mxu1 %v1034_v28  ;;  %645 = vmatmul.mubr.bf16.vlgmr.msra.gmra.mrb[4].mxu0 %v1034_v28 }
 0x11f   :  { %654 = vmatpush1.bf16.msra.mxu1 %v768_v10  ;;  %695 = vmatpush1.bf16.msra.mxu0 %v770_v11  ;;  %v208_v10 = vld [vmem:[#allocation7 + $0x1f8] sm:$0xff]  ;;  %v816_v11 = vcombine.low %v195_v63, %v199_v0  ;;  %p925_p13 = por %p924_p12, %p923_p11 }
 0x120   :  { %655 = vmatprep.subr.bf16.mxu1 %v777_v29  ;;  %696 = vmatprep.subr.bf16.mxu0 %v779_v30  ;;  %v827_v14 = vcombine.high %v204_v9, %v208_v10  ;;  %v826_v16 = vcombine.low %v204_v9, %v208_v10 }
 0x121   :  { %685 = vmatprep.mubr.bf16.mxu1 %v955_v13  ;;  %726 = vmatprep.mubr.bf16.mxu0 %v955_v13  ;;  %v825_v13 = vcombine.high %v203_v7, %v207_v8  ;;  %p926_p0 = pnand %p925_p13, %p919_p10 }
 0x123   :  { %656 = vmatpush1.bf16.msra.mxu1 %v776_v35  ;;  %697 = vmatpush1.bf16.msra.mxu0 %v778_v36 }
 0x124   :  { %657 = vmatprep.subr.bf16.mxu1 %v785_v37  ;;  %698 = vmatprep.subr.bf16.mxu0 %v787_v38 }
 0x127   :  { %658 = vmatpush1.bf16.msra.mxu1 %v784_v43  ;;  %699 = vmatpush1.bf16.msra.mxu0 %v786_v44  ;;  %v241_v43 = vsub.s32 7, %v212_v18  ;;  %v230_v44 = vrot.slane %v209_v21, %v229_v40 }
 0x128   :  { %659 = vmatprep.subr.bf16.mxu1 %v793_v45  ;;  %700 = vmatprep.subr.bf16.mxu0 %v795_v46  ;;  %v238_v45 = vrot.slane %v209_v21, %v237_v41  ;;  %v234_v46 = vrot.slane %v209_v21, %v233_v42 }
 0x129   :  { %v242_v47 = vrot.slane %v209_v21, %v241_v43 }
 0x12b   :  { %660 = vmatpush1.bf16.msra.mxu1 %v792_v51  ;;  %701 = vmatpush1.bf16.msra.mxu0 %v794_v52 }
 0x12c   :  { %661 = vmatprep.subr.bf16.mxu1 %v801_v53  ;;  %702 = vmatprep.subr.bf16.mxu0 %v803_v54 }
 0x12f   :  { %662 = vmatpush1.bf16.msra.mxu1 %v800_v59  ;;  %703 = vmatpush1.bf16.msra.mxu0 %v802_v60 }
 0x130   :  { %663 = vmatprep.subr.bf16.mxu1 %v809_v61  ;;  %704 = vmatprep.subr.bf16.mxu0 %v811_v62 }
 0x133   :  { %664 = vmatpush1.bf16.msra.mxu1 %v808_v3  ;;  %705 = vmatpush1.bf16.msra.mxu0 %v810_v4 }
 0x134   :  { %665 = vmatprep.subr.bf16.mxu1 %v817_v5  ;;  %706 = vmatprep.subr.bf16.mxu0 %v819_v6 }
 0x137   :  { %666 = vmatpush1.bf16.msra.mxu1 %v816_v11  ;;  %707 = vmatpush1.bf16.msra.mxu0 %v818_v12 }
 0x138   :  { %667 = vmatprep.subr.bf16.mxu1 %v825_v13  ;;  %708 = vmatprep.subr.bf16.mxu0 %v827_v14 }
 0x13b   :  { %668 = vmatpush1.bf16.msra.mxu1 %v824_v15  ;;  %709 = vmatpush1.bf16.msra.mxu0 %v826_v16 }
 0x13e   :  { %686 = vmatmul.mubr.bf16.vlgmr.msra.gmra.mrb[4].mxu1 %v1034_v28  ;;  %727 = vmatmul.mubr.bf16.vlgmr.msra.gmra.mrb[8].mxu0 %v1034_v28 }
 0x1f1   :  { %v605_v29 = vpop.f32.mrb[0].mxu1  ;;  %v646_v30 = vpop.f32.mrb[4].mxu0 }
 0x1f2   :  { %v606_v31 = vadd.f32 %v605_v29, %v214_v24  ;;  %v647_v32 = vadd.f32 %v646_v30, %v222_v25  ;;  %v607_v33 = vpop.f32.mrb[1].mxu1  ;;  %v648_v28 = vpop.f32.mrb[5].mxu0 }
 0x1f3   :  { %v608_v34 = vadd.f32 %v607_v33, %v218_v26  ;;  %v649_v35 = vadd.f32 %v648_v28, %v226_v27  ;;  %v609_v36 = vpop.f32.mrb[2].mxu1  ;;  %v650_v37 = vpop.f32.mrb[6].mxu0 }
 0x1f4   :  { %735 = vst [vmem:[#allocation8] sm:$0xff] %v606_v31  ;;  %737 = vst [vmem:[#allocation8 + $0x10] sm:$0xff] %v647_v32  ;;  %v610_v38 = vpop.f32.mrb[3].mxu1  ;;  %v651_v39 = vpop.f32.mrb[7].mxu0 }
 0x1f5   :  { %736 = vst [vmem:[#allocation8 + $0x8] sm:$0xff] %v608_v34  ;;  %738 = vst [vmem:[#allocation8 + $0x18] sm:$0xff] %v649_v35 }
 0x211   :  { %v687_v48 = vpop.f32.mrb[4].mxu1  ;;  %v728_v49 = vpop.f32.mrb[8].mxu0 }
 0x212   :  { %v688_v50 = vadd.f32 %v687_v48, %v230_v44  ;;  %v729_v51 = vadd.f32 %v728_v49, %v238_v45  ;;  %v689_v52 = vpop.f32.mrb[5].mxu1  ;;  %v730_v53 = vpop.f32.mrb[9].mxu0 }
 0x213   :  { %v690_v54 = vadd.f32 %v689_v52, %v234_v46  ;;  %v731_v55 = vadd.f32 %v730_v53, %v242_v47  ;;  %v691_v56 = vpop.f32.mrb[6].mxu1  ;;  %v732_v57 = vpop.f32.mrb[10].mxu0 }
 0x214   :  { %739 = vst [vmem:[#allocation8 + $0x20] sm:$0xff] %v688_v50  ;;  %741 = vst [vmem:[#allocation8 + $0x30] sm:$0xff] %v729_v51  ;;  %v692_v58 = vpop.f32.mrb[7].mxu1  ;;  %v733_v59 = vpop.f32.mrb[11].mxu0 }
 0x215   :  { %740 = vst [vmem:[#allocation8 + $0x28] sm:$0xff] %v690_v54  ;;  %742 = vst [vmem:[#allocation8 + $0x38] sm:$0xff] %v731_v55 }
 0x216   :  { %929 = shalt.err (!%p926_p0)
}
 0x217   :  { %s930_s18 = scalar_lea.hbm %s1061_s6, 1024 }
 0x218   :  { %p931_p1 = scmp.ne.s32.totalorder %s1061_s6, %s930_s18  ;;  %p934_p2 = scmp.lt.u32.totalorder %s930_s18, %s1061_s6 }
 0x21a   :  { %p936_p3 = pnand %p934_p2, %p931_p1 }
 0x21c   :  { %939 = shalt.err (!%p936_p3)
}
 0x21d   :  { %752 = dma.vmem_to_hbm [thread:$0]  %s750_s14, 1024, %s1061_s6, [#allocation4]  }
 0x21e   :  { %944 = dma.done.wait [#allocation4], 1024  }
 0x21f   :  { %945 = vsyncadd [#allocation4], 4294966272 }
 0x220   :  { %756 = vsyncpa [#allocation3], 1 }
 0x221   :  { %757 = vsyncpa [#allocation6], 1 }
 0x222   :  { %758 = vsyncpa [#allocation4], 1 }

</bundles_post_ra>
